<compile_context>
chip_gen: v7x
topology: tpu7x:2x2x1
jax: 0.10.0
libtpu: 0.0.40
codegen_flags: <defaults>
</compile_context>

<pallas_src>
from functools import partial

import jax
import jax.numpy as jnp
from jax.experimental import pallas as pl
from jax.experimental.pallas import tpu as pltpu

EPS = 1e-5          # nn.BatchNorm1d default eps
OUT_PAD = 128       # lane-dense width for the single-output projection


def mlp_kernel(n_layers,
               x_ref, w_in_ref, b_in_ref, w_d_ref, b_d_ref,
               gamma_ref, beta_ref, w_out_ref, b_out_ref,
               out_ref):
    # Hoisted loads: every parameter is read from VMEM/SMEM exactly once,
    # even though the layer loop below is fully unrolled.
    x = x_ref[...]                       # (B, D)        bf16
    w_in = w_in_ref[...]                 # (D, NP)       bf16
    b_in = b_in_ref[...]                 # (1, NP)       f32
    w_d = w_d_ref[...]                   # (NP, NP)      bf16
    b_d = b_d_ref[...]                   # (1, NP)       f32
    gamma = gamma_ref[...]               # (1, NP)       f32 (0 in padded lanes)
    beta = beta_ref[...]                 # (1, NP)       f32 (0 in padded lanes)
    w_out = w_out_ref[...]               # (NP, OUT_PAD) bf16 (only column 0 is real)
    b_out = b_out_ref[0, 0]              # scalar        f32 (SMEM)

    def bn_train(h):
        # Training-mode BatchNorm1d (biased batch statistics), fused affine:
        #   y = (h - mean) * (gamma * rsqrt(var + eps)) + beta
        mean = jnp.mean(h, axis=0, keepdims=True)
        d = h - mean
        var = jnp.mean(d * d, axis=0, keepdims=True)
        scale = gamma * jax.lax.rsqrt(var + EPS)        # rsqrt runs on the EUP slot
        return d * scale + beta

    # in_layer + ReLU + BatchNorm
    h = jnp.dot(x, w_in, preferred_element_type=jnp.float32) + b_in
    h = bn_train(jnp.maximum(h, 0.0))

    # (n_layers - 1) x [shared dense + ReLU + shared BatchNorm]; n_layers is static.
    for _ in range(n_layers - 1):
        h = jnp.dot(h.astype(jnp.bfloat16), w_d,
                    preferred_element_type=jnp.float32) + b_d
        h = bn_train(jnp.maximum(h, 0.0))

    # out_layer, padded to 128 lane-dense output columns (column 0 is the real output).
    out = jnp.dot(h.astype(jnp.bfloat16), w_out,
                  preferred_element_type=jnp.float32) + b_out
    out_ref[...] = out.astype(out_ref.dtype)


def neural_net_forward(x, params, *, n_layers=1):
    """Pallas forward pass. x: (B, input_dims) float32. Returns (B, 1) float32."""
    B, D = x.shape
    N = params["w_in"].shape[0]                 # n_neurons (PyTorch weight is (out, in))
    NP = ((N + 127) // 128) * 128               # 209 -> 256 lanes

    def pad_cols(a):                            # (1, N) -> (1, NP), zero padded
        return jnp.pad(a, ((0, 0), (0, NP - a.shape[1])))

    # Glue: pre-transpose weights to (in, out), zero-pad feature dim, bf16 matmul operands.
    w_in_t = jnp.pad(params["w_in"].T, ((0, 0), (0, NP - N))).astype(jnp.bfloat16)      # (D, NP)
    b_in = pad_cols(params["b_in"].reshape(1, N))                                       # (1, NP)
    w_d_t = jnp.pad(params["w_dense"].T, ((0, NP - N), (0, NP - N))).astype(jnp.bfloat16)
    b_d = pad_cols(params["b_dense"].reshape(1, N))
    gamma = pad_cols(params["bn_gamma"].reshape(1, N))      # padded lanes: gamma = 0
    beta = pad_cols(params["bn_beta"].reshape(1, N))        # padded lanes: beta  = 0
    w_out_t = jnp.pad(params["w_out"].T,
                      ((0, NP - N), (0, OUT_PAD - 1))).astype(jnp.bfloat16)             # (NP, 128)
    b_out = params["b_out"].reshape(1, 1).astype(jnp.float32)                           # SMEM scalar
    x_bf = x.astype(jnp.bfloat16)

    def vmem_spec(shape):
        # Whole-array block (single grid point); full-extent blocks satisfy tiling rules.
        return pl.BlockSpec(shape, lambda: (0,) * len(shape))

    vmem_operands = (x_bf, w_in_t, b_in, w_d_t, b_d, gamma, beta, w_out_t)
    in_specs = [vmem_spec(op.shape) for op in vmem_operands]
    in_specs.append(pl.BlockSpec(memory_space=pltpu.MemorySpace.SMEM))      # b_out scalar

    # TODO(synk): for large batches, switch to a batch-tiled grid with resident weights
    # (weight index_maps returning (0, 0)) and a two-pass BN (per-feature sum/sumsq
    # accumulated across batch tiles), batch axis marked "parallel" for v7x megacore;
    # at this demo scale a single grid=() invocation is optimal.
    out = pl.pallas_call(
        partial(mlp_kernel, n_layers),
        out_shape=jax.ShapeDtypeStruct((B, OUT_PAD), jnp.float32),
        grid=(),
        in_specs=in_specs,
        out_specs=vmem_spec((B, OUT_PAD)),
    )(*vmem_operands, b_out)
    return out[:, :1]


def init_params(key, input_dims, n_neurons):
    """Deterministic synthetic parameters (shapes match the PyTorch module)."""
    ks = jax.random.split(key, 3)

    def lin(k, out_f, in_f):
        bound = 1.0 / jnp.sqrt(in_f)
        kw, kb = jax.random.split(k)
        w = jax.random.uniform(kw, (out_f, in_f), jnp.float32, -bound, bound)
        b = jax.random.uniform(kb, (out_f,), jnp.float32, -bound, bound)
        return w, b

    w_in, b_in = lin(ks[0], n_neurons, input_dims)
    w_dense, b_dense = lin(ks[1], n_neurons, n_neurons)
    w_out, b_out = lin(ks[2], 1, n_neurons)
    return {
        "w_in": w_in, "b_in": b_in,
        "w_dense": w_dense, "b_dense": b_dense,
        "bn_gamma": jnp.ones((n_neurons,), jnp.float32),   # BatchNorm1d default affine init
        "bn_beta": jnp.zeros((n_neurons,), jnp.float32),
        "w_out": w_out, "b_out": b_out,
    }


def reference_forward(x, params, *, n_layers=1):
    """Pure-JAX reference mirroring the PyTorch forward (training-mode BN).

    Matmul operands are rounded to bf16 to mirror the kernel's MXU precision
    (bf16 x bf16 -> f32 accumulation); all BN math is f32, as in the kernel.
    """
    def dot_bf16(a, w):
        return jnp.dot(a.astype(jnp.bfloat16), w.astype(jnp.bfloat16),
                       preferred_element_type=jnp.float32)

    def bn(h):
        m = jnp.mean(h, axis=0, keepdims=True)
        v = jnp.mean((h - m) ** 2, axis=0, keepdims=True)
        return params["bn_gamma"] * (h - m) * jax.lax.rsqrt(v + EPS) + params["bn_beta"]

    h = bn(jnp.maximum(dot_bf16(x, params["w_in"].T) + params["b_in"], 0.0))
    for _ in range(n_layers - 1):
        h = bn(jnp.maximum(dot_bf16(h, params["w_dense"].T) + params["b_dense"], 0.0))
    return dot_bf16(h, params["w_out"].T) + params["b_out"]


if __name__ == "__main__":
    # Small shapes consistent with the module: batch=16 rows of input_dims=8 features,
    # n_neurons=209 (PyTorch __init__ default), n_layers=2 to exercise the layer loop.
    B, D, N, N_LAYERS = 16, 8, 209, 2

    key = jax.random.PRNGKey(0)
    k_x, k_p = jax.random.split(key)
    # MinMaxScaler output lives in [0, 1]; emulate with uniform inputs.
    x = jax.random.uniform(k_x, (B, D), jnp.float32, 0.0, 1.0)
    params = init_params(k_p, D, N)

    out = neural_net_forward(x, params, n_layers=N_LAYERS)
    out = jax.block_until_ready(out)

    ref = reference_forward(x, params, n_layers=N_LAYERS)
    assert out.shape == (B, 1)
    assert jnp.allclose(out, ref, atol=2e-3, rtol=2e-3), "Pallas output mismatch vs reference"

    print("KERNEL_OK")
</pallas_src>

<mosaic_0001>
module attributes {stable_mosaic.version = 11 : i64} {
  func.func @mlp_kernel(%arg0: memref<16x8xbf16, #tpu.memory_space<vmem>>, %arg1: memref<8x256xbf16, #tpu.memory_space<vmem>>, %arg2: memref<1x256xf32, #tpu.memory_space<vmem>>, %arg3: memref<256x256xbf16, #tpu.memory_space<vmem>>, %arg4: memref<1x256xf32, #tpu.memory_space<vmem>>, %arg5: memref<1x256xf32, #tpu.memory_space<vmem>>, %arg6: memref<1x256xf32, #tpu.memory_space<vmem>>, %arg7: memref<256x128xbf16, #tpu.memory_space<vmem>>, %arg8: memref<1x1xf32, #tpu.memory_space<smem>>, %arg9: memref<16x128xf32, #tpu.memory_space<vmem>>) attributes {dimension_semantics = [], scalar_prefetch = 0 : i64, scratch_operands = 0 : i64, tpu.core_type = #tpu.core_type<tc>} {
    %c0 = arith.constant 0 : index
    %c0_0 = arith.constant 0 : index
    %0 = vector.load %arg0[%c0, %c0_0] : memref<16x8xbf16, #tpu.memory_space<vmem>>, vector<16x8xbf16>
    %c0_1 = arith.constant 0 : index
    %c0_2 = arith.constant 0 : index
    %1 = vector.load %arg1[%c0_1, %c0_2] : memref<8x256xbf16, #tpu.memory_space<vmem>>, vector<8x256xbf16>
    %c0_3 = arith.constant 0 : index
    %c0_4 = arith.constant 0 : index
    %2 = vector.load %arg2[%c0_3, %c0_4] : memref<1x256xf32, #tpu.memory_space<vmem>>, vector<1x256xf32>
    %c0_5 = arith.constant 0 : index
    %c0_6 = arith.constant 0 : index
    %3 = vector.load %arg3[%c0_5, %c0_6] : memref<256x256xbf16, #tpu.memory_space<vmem>>, vector<256x256xbf16>
    %c0_7 = arith.constant 0 : index
    %c0_8 = arith.constant 0 : index
    %4 = vector.load %arg4[%c0_7, %c0_8] : memref<1x256xf32, #tpu.memory_space<vmem>>, vector<1x256xf32>
    %c0_9 = arith.constant 0 : index
    %c0_10 = arith.constant 0 : index
    %5 = vector.load %arg5[%c0_9, %c0_10] : memref<1x256xf32, #tpu.memory_space<vmem>>, vector<1x256xf32>
    %c0_11 = arith.constant 0 : index
    %c0_12 = arith.constant 0 : index
    %6 = vector.load %arg6[%c0_11, %c0_12] : memref<1x256xf32, #tpu.memory_space<vmem>>, vector<1x256xf32>
    %c0_13 = arith.constant 0 : index
    %c0_14 = arith.constant 0 : index
    %7 = vector.load %arg7[%c0_13, %c0_14] : memref<256x128xbf16, #tpu.memory_space<vmem>>, vector<256x128xbf16>
    %c0_15 = arith.constant 0 : index
    %c0_16 = arith.constant 0 : index
    %8 = memref.load %arg8[%c0_15, %c0_16] : memref<1x1xf32, #tpu.memory_space<smem>>
    %cst = arith.constant dense<0.000000e+00> : vector<16x256xf32>
    %9 = tpu.matmul %0, %1, %cst {dimension_numbers = #tpu.dot_dimension_numbers<[1], [0], [0], [1], [0, 0, 1, 1], [], []>} : vector<16x8xbf16>, vector<8x256xbf16>, vector<16x256xf32> -> vector<16x256xf32>
    %10 = vector.broadcast %2 : vector<1x256xf32> to vector<16x256xf32>
    %11 = arith.addf %9, %10 : vector<16x256xf32>
    %cst_17 = arith.constant 0.000000e+00 : f32
    %12 = vector.broadcast %cst_17 : f32 to vector<16x256xf32>
    %13 = arith.maximumf %11, %12 : vector<16x256xf32>
    %cst_18 = arith.constant dense<0.000000e+00> : vector<256xf32>
    %14 = vector.multi_reduction <add>, %13, %cst_18 [0] : vector<16x256xf32> to vector<256xf32>
    %15 = vector.shape_cast %14 : vector<256xf32> to vector<1x256xf32>
    %cst_19 = arith.constant 1.600000e+01 : f32
    %16 = vector.broadcast %cst_19 : f32 to vector<1x256xf32>
    %17 = arith.divf %15, %16 : vector<1x256xf32>
    %18 = vector.broadcast %17 : vector<1x256xf32> to vector<16x256xf32>
    %19 = arith.subf %13, %18 : vector<16x256xf32>
    %20 = arith.mulf %19, %19 : vector<16x256xf32>
    %cst_20 = arith.constant dense<0.000000e+00> : vector<256xf32>
    %21 = vector.multi_reduction <add>, %20, %cst_20 [0] : vector<16x256xf32> to vector<256xf32>
    %22 = vector.shape_cast %21 : vector<256xf32> to vector<1x256xf32>
    %cst_21 = arith.constant 1.600000e+01 : f32
    %23 = vector.broadcast %cst_21 : f32 to vector<1x256xf32>
    %24 = arith.divf %22, %23 : vector<1x256xf32>
    %cst_22 = arith.constant 9.99999974E-6 : f32
    %25 = vector.broadcast %cst_22 : f32 to vector<1x256xf32>
    %26 = arith.addf %24, %25 : vector<1x256xf32>
    %27 = math.rsqrt %26 : vector<1x256xf32>
    %28 = arith.mulf %5, %27 : vector<1x256xf32>
    %29 = vector.broadcast %28 : vector<1x256xf32> to vector<16x256xf32>
    %30 = arith.mulf %19, %29 : vector<16x256xf32>
    %31 = vector.broadcast %6 : vector<1x256xf32> to vector<16x256xf32>
    %32 = arith.addf %30, %31 : vector<16x256xf32>
    %33 = arith.truncf %32 : vector<16x256xf32> to vector<16x256xbf16>
    %cst_23 = arith.constant dense<0.000000e+00> : vector<16x256xf32>
    %34 = tpu.matmul %33, %3, %cst_23 {dimension_numbers = #tpu.dot_dimension_numbers<[1], [0], [0], [1], [0, 0, 1, 1], [], []>} : vector<16x256xbf16>, vector<256x256xbf16>, vector<16x256xf32> -> vector<16x256xf32>
    %35 = vector.broadcast %4 : vector<1x256xf32> to vector<16x256xf32>
    %36 = arith.addf %34, %35 : vector<16x256xf32>
    %cst_24 = arith.constant 0.000000e+00 : f32
    %37 = vector.broadcast %cst_24 : f32 to vector<16x256xf32>
    %38 = arith.maximumf %36, %37 : vector<16x256xf32>
    %cst_25 = arith.constant dense<0.000000e+00> : vector<256xf32>
    %39 = vector.multi_reduction <add>, %38, %cst_25 [0] : vector<16x256xf32> to vector<256xf32>
    %40 = vector.shape_cast %39 : vector<256xf32> to vector<1x256xf32>
    %cst_26 = arith.constant 1.600000e+01 : f32
    %41 = vector.broadcast %cst_26 : f32 to vector<1x256xf32>
    %42 = arith.divf %40, %41 : vector<1x256xf32>
    %43 = vector.broadcast %42 : vector<1x256xf32> to vector<16x256xf32>
    %44 = arith.subf %38, %43 : vector<16x256xf32>
    %45 = arith.mulf %44, %44 : vector<16x256xf32>
    %cst_27 = arith.constant dense<0.000000e+00> : vector<256xf32>
    %46 = vector.multi_reduction <add>, %45, %cst_27 [0] : vector<16x256xf32> to vector<256xf32>
    %47 = vector.shape_cast %46 : vector<256xf32> to vector<1x256xf32>
    %cst_28 = arith.constant 1.600000e+01 : f32
    %48 = vector.broadcast %cst_28 : f32 to vector<1x256xf32>
    %49 = arith.divf %47, %48 : vector<1x256xf32>
    %cst_29 = arith.constant 9.99999974E-6 : f32
    %50 = vector.broadcast %cst_29 : f32 to vector<1x256xf32>
    %51 = arith.addf %49, %50 : vector<1x256xf32>
    %52 = math.rsqrt %51 : vector<1x256xf32>
    %53 = arith.mulf %5, %52 : vector<1x256xf32>
    %54 = vector.broadcast %53 : vector<1x256xf32> to vector<16x256xf32>
    %55 = arith.mulf %44, %54 : vector<16x256xf32>
    %56 = vector.broadcast %6 : vector<1x256xf32> to vector<16x256xf32>
    %57 = arith.addf %55, %56 : vector<16x256xf32>
    %58 = arith.truncf %57 : vector<16x256xf32> to vector<16x256xbf16>
    %cst_30 = arith.constant dense<0.000000e+00> : vector<16x128xf32>
    %59 = tpu.matmul %58, %7, %cst_30 {dimension_numbers = #tpu.dot_dimension_numbers<[1], [0], [0], [1], [0, 0, 1, 1], [], []>} : vector<16x256xbf16>, vector<256x128xbf16>, vector<16x128xf32> -> vector<16x128xf32>
    %60 = vector.broadcast %8 : f32 to vector<16x128xf32>
    %61 = arith.addf %59, %60 : vector<16x128xf32>
    %c0_31 = arith.constant 0 : index
    %c0_32 = arith.constant 0 : index
    %62 = vector.load %arg9[%c0_31, %c0_32] : memref<16x128xf32, #tpu.memory_space<vmem>>, vector<16x128xf32>
    tpu.vector_store %arg9[%c0_31, %c0_32], %61 {strides = array<i32>} : memref<16x128xf32, #tpu.memory_space<vmem>>, vector<16x128xf32>,
    return
  }
}

</mosaic_0001>

<bundles_post_ra>
// kernel: tpu_custom_call.1
= control target key start
LH: loop header
LB: loop body
LE: loop exit
PB: predicated region body
PF: predicated region fallthrough
CT: control target
= control target key end

     0   :  { %15 = vsyncpa [#allocation4], 0  ;;  %s1164_s0 = inlined_call_operand.vmem [shape: bf16[16,8], index: 0, kind: input, shape index: {}]   ;;  %s1165_s1 = inlined_call_operand.vmem [shape: bf16[8,256], index: 1, kind: input, shape index: {}]   ;;  %s1166_s2 = inlined_call_operand.vmem [shape: f32[1,256], index: 2, kind: input, shape index: {}]   ;;  %s1167_s3 = inlined_call_operand.hbm [shape: bf16[256,256], index: 3, kind: input, shape index: {}]   ;;  %s1168_s4 = inlined_call_operand.vmem [shape: f32[1,256], index: 4, kind: input, shape index: {}]   ;;  %s1169_s5 = inlined_call_operand.vmem [shape: f32[1,256], index: 5, kind: input, shape index: {}]   ;;  %s1170_s6 = inlined_call_operand.vmem [shape: f32[1,256], index: 6, kind: input, shape index: {}]   ;;  %s1171_s7 = inlined_call_operand.hbm [shape: bf16[256,128], index: 7, kind: input, shape index: {}]   ;;  %s1172_s8 = inlined_call_operand.<no memory space> [shape: f32[1,1], index: 8, kind: input, shape index: {}]   ;;  %s1173_s9 = inlined_call_operand.hbm [shape: f32[16,128], index: 9, kind: output, shape index: {}]  }
   0x1   :  { %16 = vsyncpa [#allocation7], 0 }
   0x2   :  { %17 = vsyncpa [#allocation5], 0  ;;  %s1001_s30 = smov [#allocation3]   ;;  %s929_s13 = scalar_lea.hbm %s1167_s3, 4096 }
   0x3   :  { %s29_s10 = sshll.u32 %s1001_s30, 4  ;;  %p930_p0 = scmp.ne.s32.totalorder %s1167_s3, %s929_s13  ;;  %s30_s10 = int_to_ptr.vmem [resolvable:$true] %s29_s10 }
   0x4   :  { %p933_p1 = scmp.lt.u32.totalorder %s929_s13, %s1167_s3 }
   0x6   :  { %p935_p2 = pnand %p933_p1, %p930_p0 }
   0x8   :  { %938 = shalt.err (!%p935_p2)
}
   0x9   :  { %s939_s18 = scalar_lea.vmem %s30_s10, 4096  ;;  %p944_p4 = scmp.lt.s32.totalorder %s30_s10, %s30_s10 }
   0xa   :  { %p940_p3 = scmp.ne.s32.totalorder %s30_s10, %s939_s18  ;;  %p945_p5 = scmp.lt.s32.totalorder %s939_s18, %s939_s18 }
   0xc   :  { %p946_p6 = por %p945_p5, %p944_p4 }
   0xe   :  { %p947_p7 = pnand %p946_p6, %p940_p3 }
  0x10   :  { %950 = shalt.err (!%p947_p7)
}
  0x11   :  { %s1002_s19 = smov 128   ;;  %s1003_s20 = smov 8  }
  0x12   :  { %35 = dma.hbm_to_vmem [thread:$0]  %s1167_s3, 4096, %s30_s10, [#allocation4], %s1002_s19, %s1002_s19, %s1003_s20  }
  0x13   :  { %s1004_s23 = smov [#allocation6]   ;;  %s951_s27 = scalar_lea.hbm %s1171_s7, 2048 }
  0x14   :  { %s47_s24 = sshll.u32 %s1004_s23, 4  ;;  %p952_p8 = scmp.ne.s32.totalorder %s1171_s7, %s951_s27  ;;  %s48_s24 = int_to_ptr.vmem [resolvable:$true] %s47_s24 }
  0x15   :  { %p955_p9 = scmp.lt.u32.totalorder %s951_s27, %s1171_s7 }
  0x17   :  { %p957_p10 = pnand %p955_p9, %p952_p8 }
  0x19   :  { %960 = shalt.err (!%p957_p10)
}
  0x1a   :  { %s961_s12 = scalar_lea.vmem %s48_s24, 2048  ;;  %p966_p12 = scmp.lt.s32.totalorder %s48_s24, %s48_s24 }
  0x1b   :  { %p962_p11 = scmp.ne.s32.totalorder %s48_s24, %s961_s12  ;;  %p967_p13 = scmp.lt.s32.totalorder %s961_s12, %s961_s12 }
  0x1d   :  { %p968_p0 = por %p967_p13, %p966_p12 }
  0x1f   :  { %p969_p1 = pnand %p968_p0, %p962_p11 }
  0x21   :  { %972 = shalt.err (!%p969_p1)
}
  0x22   :  { %s1005_s3 = smov 64   ;;  %s1006_s10 = smov 4  }
  0x23   :  { %53 = dma.hbm_to_vmem [thread:$0]  %s1171_s7, 2048, %s48_s24, [#allocation7], %s1005_s3, %s1005_s3, %s1006_s10  }
  0x24   :  { %995 = dma.done.wait [#allocation4], 4096  }
  0x25   :  { %996 = vsyncadd [#allocation4], 4294963200 }
  0x26   :  { %997 = dma.done.wait [#allocation7], 2048  }
  0x27   :  { %998 = vsyncadd [#allocation7], 4294965248  ;;  %v1007_v0 = vmov 0   ;;  %v65_v1 = vld [vmem:[%s1165_s1] sm:$0xff]  ;;  %vm160_vm0 = vcmask 1043456   ;;  %vm156_vm1 = vcmask 64512   ;;  %v136_v38 = vlaneseq }
  0x28   :  { %199 = vmatprep.mubr.bf16.mxu0 %v1007_v0  ;;  %v772_v2 = vcombine.high %v65_v1, %v65_v1  ;;  %v771_v3 = vcombine.low %v65_v1, %v65_v1  ;;  %v856_v4 = vld [vmem:[%s1164_s0] sm:$0xff]   ;;  %v860_v8 = vld [vmem:[#allocation3 + $0x14] ss:$8 sps:$4 sm:$0xff]   ;;  %v862_v9 = vld [vmem:[#allocation3 + $0x10] ss:$8 sps:$4 sm:$0xff]   ;;  %s1009_s24 = smov [#allocation8]  }
  0x29   :  { %v857_v6 = vld [vmem:[#allocation3 + $0x4] ss:$8 sps:$4 sm:$0xff]   ;;  %v859_v7 = vld [vmem:[#allocation3] ss:$8 sps:$4 sm:$0xff]   ;;  %v866_v12 = vld [vmem:[#allocation3 + $0x34] ss:$8 sps:$4 sm:$0xff]  }
  0x2a   :  { %773 = vmatprep.subr.msk.bf16.mxu0 %vm160_vm0, %v772_v2  ;;  %v162_v5 = vsel %vm160_vm0, %v771_v3, 0  ;;  %481 = vmatprep.subr.bf16.mxu1 %v857_v6  ;;  %v863_v10 = vld [vmem:[#allocation3 + $0x24] ss:$8 sps:$4 sm:$0xff]   ;;  %v865_v11 = vld [vmem:[#allocation3 + $0x20] ss:$8 sps:$4 sm:$0xff]   ;;  %v1093_v39 = vshrl.u32 %v136_v38, 7 }
  0x2b   :  { %168 = vmatpush1.bf16.msra.mxu0 %v162_v5  ;;  %482 = vmatpush1.bf16.msra.mxu1 %v859_v7  ;;  %v868_v13 = vld [vmem:[#allocation3 + $0x30] ss:$8 sps:$4 sm:$0xff]   ;;  %v869_v14 = vld [vmem:[#allocation3 + $0x44] ss:$8 sps:$4 sm:$0xff]   ;;  %v871_v15 = vld [vmem:[#allocation3 + $0x40] ss:$8 sps:$4 sm:$0xff]  }
  0x2c   :  { %483 = vmatprep.subr.bf16.mxu1 %v860_v8  ;;  %v872_v16 = vld [vmem:[#allocation3 + $0x54] ss:$8 sps:$4 sm:$0xff]   ;;  %v874_v17 = vld [vmem:[#allocation3 + $0x50] ss:$8 sps:$4 sm:$0xff]   ;;  %v875_v18 = vld [vmem:[#allocation3 + $0x64] ss:$8 sps:$4 sm:$0xff]  }
  0x2d   :  { %v877_v19 = vld [vmem:[#allocation3 + $0x60] ss:$8 sps:$4 sm:$0xff]   ;;  %v878_v20 = vld [vmem:[#allocation3 + $0x74] ss:$8 sps:$4 sm:$0xff]   ;;  %v880_v21 = vld [vmem:[#allocation3 + $0x70] ss:$8 sps:$4 sm:$0xff]  }
  0x2e   :  { %774 = vmatmul.mubr.msk.bf16.vlgmr.msra.gmra.mrb[0].mxu0 %vm156_vm1, %v856_v4  ;;  %v881_v22 = vld [vmem:[#allocation3 + $0x84] ss:$8 sps:$4 sm:$0xff]   ;;  %v883_v23 = vld [vmem:[#allocation3 + $0x80] ss:$8 sps:$4 sm:$0xff]   ;;  %v884_v24 = vld [vmem:[#allocation3 + $0x94] ss:$8 sps:$4 sm:$0xff]  }
  0x2f   :  { %484 = vmatpush1.bf16.msra.mxu1 %v862_v9  ;;  %v886_v25 = vld [vmem:[#allocation3 + $0x90] ss:$8 sps:$4 sm:$0xff]   ;;  %v887_v26 = vld [vmem:[#allocation3 + $0xa4] ss:$8 sps:$4 sm:$0xff]   ;;  %v889_v27 = vld [vmem:[#allocation3 + $0xa0] ss:$8 sps:$4 sm:$0xff]  }
  0x30   :  { %485 = vmatprep.subr.bf16.mxu1 %v863_v10  ;;  %v890_v28 = vld [vmem:[#allocation3 + $0xb4] ss:$8 sps:$4 sm:$0xff]   ;;  %v892_v29 = vld [vmem:[#allocation3 + $0xb0] ss:$8 sps:$4 sm:$0xff]   ;;  %v893_v30 = vld [vmem:[#allocation3 + $0xc4] ss:$8 sps:$4 sm:$0xff]  }
  0x31   :  { %v895_v31 = vld [vmem:[#allocation3 + $0xc0] ss:$8 sps:$4 sm:$0xff]   ;;  %v896_v32 = vld [vmem:[#allocation3 + $0xd4] ss:$8 sps:$4 sm:$0xff]   ;;  %v898_v33 = vld [vmem:[#allocation3 + $0xd0] ss:$8 sps:$4 sm:$0xff]  }
  0x32   :  { %v899_v34 = vld [vmem:[#allocation3 + $0xe4] ss:$8 sps:$4 sm:$0xff]   ;;  %v901_v35 = vld [vmem:[#allocation3 + $0xe0] ss:$8 sps:$4 sm:$0xff]   ;;  %v902_v36 = vld [vmem:[#allocation3 + $0xf4] ss:$8 sps:$4 sm:$0xff]  }
  0x33   :  { %486 = vmatpush1.bf16.msra.mxu1 %v865_v11  ;;  %v904_v37 = vld [vmem:[#allocation3 + $0xf0] ss:$8 sps:$4 sm:$0xff]   ;;  %v1096_v40 = vsub.s32 0, %v1093_v39  ;;  %v66_v41 = vld [vmem:[%s1166_s2] sm:$0x3]  ;;  %v1102_v42 = vsub.s32 1, %v1093_v39 }
  0x34   :  { %487 = vmatprep.subr.bf16.mxu1 %v866_v12  ;;  %s757_s25 = sshll.u32 %s1009_s24, 4  ;;  %s758_s25 = int_to_ptr.vmem [resolvable:$true] %s757_s25 }
  0x35   :  { %v139_v43 = vrot.slane %v66_v41, %v1096_v40  ;;  %v143_v44 = vrot.slane %v66_v41, %v1102_v42  ;;  %s973_s26 = scalar_lea.vmem %s758_s25, 256  ;;  %p978_p3 = scmp.lt.s32.totalorder %s758_s25, %s758_s25 }
  0x36   :  { %p974_p2 = scmp.ne.s32.totalorder %s758_s25, %s973_s26  ;;  %p979_p4 = scmp.lt.s32.totalorder %s973_s26, %s973_s26 }
  0x37   :  { %488 = vmatpush1.bf16.msra.mxu1 %v868_v13 }
  0x38   :  { %489 = vmatprep.subr.bf16.mxu1 %v869_v14  ;;  %p980_p5 = por %p979_p4, %p978_p3 }
  0x3a   :  { %p981_p6 = pnand %p980_p5, %p974_p2 }
  0x3b   :  { %490 = vmatpush1.bf16.msra.mxu1 %v871_v15 }
  0x3c   :  { %491 = vmatprep.subr.bf16.mxu1 %v872_v16 }
  0x3f   :  { %492 = vmatpush1.bf16.msra.mxu1 %v874_v17 }
  0x40   :  { %493 = vmatprep.subr.bf16.mxu1 %v875_v18 }
  0x43   :  { %494 = vmatpush1.bf16.msra.mxu1 %v877_v19 }
  0x44   :  { %495 = vmatprep.subr.bf16.mxu1 %v878_v20 }
  0x47   :  { %496 = vmatpush1.bf16.msra.mxu1 %v880_v21 }
  0x48   :  { %497 = vmatprep.subr.bf16.mxu1 %v881_v22 }
  0x4b   :  { %498 = vmatpush1.bf16.msra.mxu1 %v883_v23 }
  0x4c   :  { %499 = vmatprep.subr.bf16.mxu1 %v884_v24 }
  0x4f   :  { %500 = vmatpush1.bf16.msra.mxu1 %v886_v25 }
  0x50   :  { %501 = vmatprep.subr.bf16.mxu1 %v887_v26 }
  0x53   :  { %502 = vmatpush1.bf16.msra.mxu1 %v889_v27 }
  0x54   :  { %503 = vmatprep.subr.bf16.mxu1 %v890_v28 }
  0x57   :  { %504 = vmatpush1.bf16.msra.mxu1 %v892_v29 }
  0x58   :  { %505 = vmatprep.subr.bf16.mxu1 %v893_v30 }
  0x5b   :  { %506 = vmatpush1.bf16.msra.mxu1 %v895_v31 }
  0x5c   :  { %507 = vmatprep.subr.bf16.mxu1 %v896_v32 }
  0x5f   :  { %508 = vmatpush1.bf16.msra.mxu1 %v898_v33 }
  0x60   :  { %509 = vmatprep.subr.bf16.mxu1 %v899_v34 }
  0x63   :  { %510 = vmatpush1.bf16.msra.mxu1 %v901_v35  ;;  %v1008_v35 = vmov 1966171168  }
  0x64   :  { %511 = vmatprep.subr.bf16.mxu1 %v902_v36  ;;  %v263_v36 = vunpack.c.l.s4 %v1008_v35 }
  0x67   :  { %512 = vmatpush1.bf16.msra.mxu1 %v904_v37  ;;  %v264_v37 = vunpack.c.0.s8 %v263_v36 }
  0x69   :  { %v1107_v41 = vsub.s32 %v264_v37, %v1093_v39 }
 0x101   :  { %v201_v45 = vpop.f32.mrb[0].mxu0 }
 0x102   :  { %v202_v46 = vadd.f32 %v201_v45, %v139_v43  ;;  %v203_v47 = vpop.f32.mrb[1].mxu0 }
 0x103   :  { %v204_v48 = vadd.f32 %v203_v47, %v143_v44  ;;  %v205_v49 = vpop.f32.mrb[2].mxu0 }
 0x104   :  { %v206_v50 = vadd.f32 %v205_v49, %v139_v43  ;;  %v207_v51 = vpop.f32.mrb[3].mxu0  ;;  %v210_v53 = vmax.f32 %v202_v46, 0.0  ;;  %v1113_v46 = vld [vmem:[%s1169_s5] sm:$0x3] }
 0x105   :  { %v208_v52 = vadd.f32 %v207_v51, %v143_v44  ;;  %v211_v55 = vmax.f32 %v204_v48, 0.0  ;;  %v101_v48 = vld [vmem:[%s1170_s6] sm:$0x3] }
 0x106   :  { %v212_v54 = vmax.f32 %v206_v50, 0.0  ;;  %v1122_v50 = vrot.slane %v101_v48, %v1096_v40  ;;  %v1125_v51 = vrot.slane %v101_v48, %v1102_v42 }
 0x107   :  { %v213_v56 = vmax.f32 %v208_v52, 0.0 }
 0x108   :  { %v214_v57 = vadd.f32 %v212_v54, %v210_v53 }
 0x109   :  { %v221_v58 = vadd.f32 %v213_v56, %v211_v55 }
 0x10a   :  { %v215_v59 = vrot.slane %v214_v57, 4 }
 0x10b   :  { %v222_v60 = vrot.slane %v221_v58, 4 }
 0x10c   :  { %v216_v61 = vadd.f32 %v215_v59, %v214_v57 }
 0x10d   :  { %v223_v62 = vadd.f32 %v222_v60, %v221_v58 }
 0x10e   :  { %v217_v63 = vrot.slane %v216_v61, 2 }
 0x10f   :  { %v224_v0 = vrot.slane %v223_v62, 2 }
 0x110   :  { %v218_v1 = vadd.f32 %v217_v63, %v216_v61  ;;  %v905_v63 = vld [vmem:[#allocation6 + $0x40] sm:$0xff]  }
 0x111   :  { %v225_v2 = vadd.f32 %v224_v0, %v223_v62  ;;  %v906_v0 = vld [vmem:[#allocation6] sm:$0xff]   ;;  %823 = vmatprep.subr.bf16.mxu0 %v905_v63 }
 0x112   :  { %v219_v3 = vrot.slane %v218_v1, 1  ;;  %824 = vmatpush3.bf16.msra.mxu0 %v906_v0 }
 0x113   :  { %v226_v4 = vrot.slane %v225_v2, 1 }
 0x114   :  { %v220_v5 = vadd.f32 %v219_v3, %v218_v1  ;;  %v907_v1 = vld [vmem:[#allocation6 + $0x48] sm:$0xff]   ;;  %v909_v3 = vld [vmem:[#allocation6 + $0x50] sm:$0xff]  }
 0x115   :  { %v227_v6 = vadd.f32 %v226_v4, %v225_v2  ;;  %v908_v2 = vld [vmem:[#allocation6 + $0x8] sm:$0xff]   ;;  %825 = vmatprep.subr.bf16.mxu0 %v907_v1  ;;  %v910_v4 = vld [vmem:[#allocation6 + $0x10] sm:$0xff]  }
 0x116   :  { %v229_v7 = vmul.f32 0.0625, %v220_v5  ;;  %826 = vmatpush3.bf16.msra.mxu0 %v908_v2  ;;  %v911_v5 = vld [vmem:[#allocation6 + $0x58] sm:$0xff]  }
 0x117   :  { %v230_v8 = vmul.f32 0.0625, %v227_v6  ;;  %827 = vmatprep.subr.bf16.mxu0 %v909_v3  ;;  %v912_v6 = vld [vmem:[#allocation6 + $0x18] sm:$0xff]  }
 0x118   :  { %v231_v9 = vsub.f32 %v210_v53, %v229_v7  ;;  %v233_v10 = vsub.f32 %v212_v54, %v229_v7  ;;  %v913_v7 = vld [vmem:[#allocation6 + $0x60] sm:$0xff]  }
 0x119   :  { %v234_v11 = vsub.f32 %v213_v56, %v230_v8  ;;  %v232_v12 = vsub.f32 %v211_v55, %v230_v8  ;;  %v914_v8 = vld [vmem:[#allocation6 + $0x20] sm:$0xff]  }
 0x11a   :  { %v235_v13 = vmul.f32 %v231_v9, %v231_v9  ;;  %v237_v14 = vmul.f32 %v233_v10, %v233_v10  ;;  %828 = vmatpush3.bf16.msra.mxu0 %v910_v4 }
 0x11b   :  { %v238_v15 = vmul.f32 %v234_v11, %v234_v11  ;;  %v236_v16 = vmul.f32 %v232_v12, %v232_v12  ;;  %829 = vmatprep.subr.bf16.mxu0 %v911_v5 }
 0x11c   :  { %v239_v17 = vadd.f32 %v237_v14, %v235_v13  ;;  %v919_v13 = vld [vmem:[#allocation6 + $0x78] sm:$0xff]  }
 0x11d   :  { %v246_v18 = vadd.f32 %v238_v15, %v236_v16  ;;  %v920_v14 = vld [vmem:[#allocation6 + $0x38] sm:$0xff]   ;;  %v99_v15 = vld [vmem:[%s1168_s4] sm:$0x3] }
 0x11e   :  { %v240_v19 = vrot.slane %v239_v17, 4  ;;  %830 = vmatpush3.bf16.msra.mxu0 %v912_v6  ;;  %v314_v16 = vrot.slane %v99_v15, %v1096_v40 }
 0x11f   :  { %v247_v20 = vrot.slane %v246_v18, 4  ;;  %831 = vmatprep.subr.bf16.mxu0 %v913_v7 }
 0x120   :  { %v241_v21 = vadd.f32 %v240_v19, %v239_v17  ;;  %v318_v17 = vrot.slane %v99_v15, %v1102_v42 }
 0x121   :  { %v248_v22 = vadd.f32 %v247_v20, %v246_v18 }
 0x122   :  { %v242_v23 = vrot.slane %v241_v21, 2  ;;  %832 = vmatpush3.bf16.msra.mxu0 %v914_v8 }
 0x123   :  { %v249_v24 = vrot.slane %v248_v22, 2 }
 0x124   :  { %v243_v25 = vadd.f32 %v242_v23, %v241_v21 }
 0x125   :  { %v250_v26 = vadd.f32 %v249_v24, %v248_v22 }
 0x126   :  { %v244_v27 = vrot.slane %v243_v25, 1 }
 0x127   :  { %v251_v28 = vrot.slane %v250_v26, 1 }
 0x128   :  { %v245_v29 = vadd.f32 %v244_v27, %v243_v25 }
 0x129   :  { %v252_v30 = vadd.f32 %v251_v28, %v250_v26 }
 0x12a   :  { %v253_v31 = vmul.f32 0.0625, %v245_v29 }
 0x12b   :  { %v254_v32 = vmul.f32 0.0625, %v252_v30 }
 0x12c   :  { %v255_v33 = vadd.f32 1e-05, %v253_v31 }
 0x12d   :  { %v256_v34 = vadd.f32 1e-05, %v254_v32 }
 0x12e   :  { %921 = vrsqrt.f32 %v255_v33 }
 0x12f   :  { %923 = vrsqrt.f32 %v256_v34 }
 0x138   :  { %v922_v38 = vpop.eup %921 }
 0x139   :  { %v924_v43 = vpop.eup %923 }
 0x13a   :  { %v261_v44 = vcombine.low %v922_v38, %v924_v43 }
 0x13c   :  { %v268_v45 = vrot.slane %v261_v44, %v1107_v41 }
 0x13e   :  { %v275_v47 = vrot.slane %v268_v45, %v1107_v41 }
 0x140   :  { %v277_v49 = vmul.f32 %v275_v47, %v1113_v46 }
 0x142   :  { %v286_v39 = vrot.slane %v277_v49, %v1102_v42  ;;  %v282_v52 = vrot.slane %v277_v49, %v1096_v40 }
 0x144   :  { %v290_v53 = vmul.f32 %v286_v39, %v232_v12  ;;  %v292_v54 = vmul.f32 %v286_v39, %v234_v11  ;;  %v289_v55 = vmul.f32 %v282_v52, %v231_v9  ;;  %v291_v56 = vmul.f32 %v282_v52, %v233_v10  ;;  %v915_v9 = vld [vmem:[#allocation6 + $0x68] sm:$0xff]   ;;  %v917_v11 = vld [vmem:[#allocation6 + $0x70] sm:$0xff]  }
 0x145   :  { %v916_v10 = vld [vmem:[#allocation6 + $0x28] sm:$0xff]   ;;  %833 = vmatprep.subr.bf16.mxu0 %v915_v9  ;;  %v918_v12 = vld [vmem:[#allocation6 + $0x30] sm:$0xff]  }
 0x146   :  { %v305_v57 = vadd.f32 %v1125_v51, %v290_v53  ;;  %v307_v58 = vadd.f32 %v1125_v51, %v292_v54  ;;  %v304_v59 = vadd.f32 %v1122_v50, %v289_v55  ;;  %v306_v60 = vadd.f32 %v1122_v50, %v291_v56  ;;  %834 = vmatpush3.bf16.msra.mxu0 %v916_v10 }
 0x147   :  { %835 = vmatprep.subr.bf16.mxu0 %v917_v11 }
 0x148   :  { %v309_v61 = vpack.c.bf16 %v307_v58, %v305_v57  ;;  %v308_v62 = vpack.c.bf16 %v306_v60, %v304_v59 }
 0x14a   :  { %513 = vmatprep.mubr.bf16.mxu1 %v309_v61  ;;  %836 = vmatpush3.bf16.msra.mxu0 %v918_v12 }
 0x14b   :  { %514 = vmatmul.mubr.bf16.vlgmr.msra.gmra.mrb[0].mxu1 %v308_v62  ;;  %837 = vmatprep.subr.bf16.mxu0 %v919_v13 }
 0x14e   :  { %838 = vmatpush3.bf16.msra.mxu0 %v920_v14 }
 0x21e   :  { %v515_v18 = vpop.f32.mrb[0].mxu1 }
 0x21f   :  { %v516_v19 = vadd.f32 %v515_v18, %v314_v16  ;;  %v517_v20 = vpop.f32.mrb[1].mxu1 }
 0x220   :  { %v518_v21 = vadd.f32 %v517_v20, %v318_v17  ;;  %v519_v22 = vpop.f32.mrb[2].mxu1 }
 0x221   :  { %v520_v23 = vadd.f32 %v519_v22, %v314_v16  ;;  %v521_v24 = vpop.f32.mrb[3].mxu1  ;;  %v524_v26 = vmax.f32 %v516_v19, 0.0 }
 0x222   :  { %v522_v25 = vadd.f32 %v521_v24, %v318_v17  ;;  %v525_v28 = vmax.f32 %v518_v21, 0.0 }
 0x223   :  { %v526_v27 = vmax.f32 %v520_v23, 0.0 }
 0x224   :  { %v527_v29 = vmax.f32 %v522_v25, 0.0 }
 0x225   :  { %v528_v30 = vadd.f32 %v526_v27, %v524_v26 }
 0x226   :  { %v535_v31 = vadd.f32 %v527_v29, %v525_v28 }
 0x227   :  { %v529_v32 = vrot.slane %v528_v30, 4 }
 0x228   :  { %v536_v33 = vrot.slane %v535_v31, 4 }
 0x229   :  { %v530_v34 = vadd.f32 %v529_v32, %v528_v30 }
 0x22a   :  { %v537_v35 = vadd.f32 %v536_v33, %v535_v31 }
 0x22b   :  { %v531_v36 = vrot.slane %v530_v34, 2 }
 0x22c   :  { %v538_v37 = vrot.slane %v537_v35, 2 }
 0x22d   :  { %v532_v38 = vadd.f32 %v531_v36, %v530_v34 }
 0x22e   :  { %v539_v43 = vadd.f32 %v538_v37, %v537_v35 }
 0x22f   :  { %v533_v44 = vrot.slane %v532_v38, 1 }
 0x230   :  { %v540_v45 = vrot.slane %v539_v43, 1 }
 0x231   :  { %v534_v47 = vadd.f32 %v533_v44, %v532_v38 }
 0x232   :  { %v541_v48 = vadd.f32 %v540_v45, %v539_v43 }
 0x233   :  { %v542_v49 = vmul.f32 0.0625, %v534_v47 }
 0x234   :  { %v543_v39 = vmul.f32 0.0625, %v541_v48 }
 0x235   :  { %v544_v52 = vsub.f32 %v524_v26, %v542_v49  ;;  %v546_v53 = vsub.f32 %v526_v27, %v542_v49 }
 0x236   :  { %v545_v54 = vsub.f32 %v525_v28, %v543_v39  ;;  %v547_v55 = vsub.f32 %v527_v29, %v543_v39 }
 0x237   :  { %v548_v56 = vmul.f32 %v544_v52, %v544_v52  ;;  %v550_v57 = vmul.f32 %v546_v53, %v546_v53 }
 0x238   :  { %v549_v58 = vmul.f32 %v545_v54, %v545_v54  ;;  %v551_v59 = vmul.f32 %v547_v55, %v547_v55 }
 0x239   :  { %v552_v60 = vadd.f32 %v550_v57, %v548_v56 }
 0x23a   :  { %v559_v61 = vadd.f32 %v551_v59, %v549_v58 }
 0x23b   :  { %v553_v62 = vrot.slane %v552_v60, 4 }
 0x23c   :  { %v560_v63 = vrot.slane %v559_v61, 4 }
 0x23d   :  { %v554_v0 = vadd.f32 %v553_v62, %v552_v60 }
 0x23e   :  { %v561_v1 = vadd.f32 %v560_v63, %v559_v61 }
 0x23f   :  { %v555_v2 = vrot.slane %v554_v0, 2 }
 0x240   :  { %v562_v3 = vrot.slane %v561_v1, 2 }
 0x241   :  { %v556_v4 = vadd.f32 %v555_v2, %v554_v0 }
 0x242   :  { %v563_v5 = vadd.f32 %v562_v3, %v561_v1 }
 0x243   :  { %v557_v6 = vrot.slane %v556_v4, 1 }
 0x244   :  { %v564_v7 = vrot.slane %v563_v5, 1 }
 0x245   :  { %v558_v8 = vadd.f32 %v557_v6, %v556_v4 }
 0x246   :  { %v565_v9 = vadd.f32 %v564_v7, %v563_v5 }
 0x247   :  { %v566_v10 = vmul.f32 0.0625, %v558_v8 }
 0x248   :  { %v567_v11 = vmul.f32 0.0625, %v565_v9 }
 0x249   :  { %v568_v12 = vadd.f32 1e-05, %v566_v10 }
 0x24a   :  { %v569_v13 = vadd.f32 1e-05, %v567_v11 }
 0x24b   :  { %925 = vrsqrt.f32 %v568_v12 }
 0x24c   :  { %927 = vrsqrt.f32 %v569_v13 }
 0x255   :  { %v926_v14 = vpop.eup %925 }
 0x256   :  { %v928_v15 = vpop.eup %927 }
 0x257   :  { %v574_v16 = vcombine.low %v926_v14, %v928_v15 }
 0x259   :  { %v581_v17 = vrot.slane %v574_v16, %v1107_v41 }
 0x25b   :  { %v588_v18 = vrot.slane %v581_v17, %v1107_v41 }
 0x25d   :  { %v590_v19 = vmul.f32 %v588_v18, %v1113_v46 }
 0x25f   :  { %v595_v20 = vrot.slane %v590_v19, %v1096_v40  ;;  %v599_v21 = vrot.slane %v590_v19, %v1102_v42  ;;  %v612_v40 = vstv %s1172_s8 }
 0x261   :  { %v605_v22 = vmul.f32 %v599_v21, %v547_v55  ;;  %v603_v23 = vmul.f32 %v599_v21, %v545_v54  ;;  %v602_v24 = vmul.f32 %v595_v20, %v544_v52  ;;  %v604_v25 = vmul.f32 %v595_v20, %v546_v53 }
 0x263   :  { %v607_v26 = vadd.f32 %v603_v23, %v1125_v51  ;;  %v609_v27 = vadd.f32 %v605_v22, %v1125_v51  ;;  %v606_v28 = vadd.f32 %v602_v24, %v1122_v50  ;;  %v608_v29 = vadd.f32 %v604_v25, %v1122_v50 }
 0x265   :  { %v611_v30 = vpack.c.bf16 %v609_v27, %v607_v26  ;;  %v610_v41 = vpack.c.bf16 %v608_v29, %v606_v28 }
 0x267   :  { %741 = vmatprep.mubr.bf16.mxu0 %v611_v30 }
 0x268   :  { %742 = vmatmul.mubr.bf16.vlgmr.msra.gmra.mrb[4].mxu0 %v610_v41 }
 0x33b   :  { %v839_v46 = vpop.f32.mrb[4].mxu0 }
 0x33c   :  { %v840_v42 = vpop.f32.mrb[5].mxu0 }
 0x33d   :  { %v841_v31 = vadd.f32 %v840_v42, %v839_v46  ;;  %v842_v32 = vpop.f32.mrb[6].mxu0 }
 0x33e   :  { %v843_v33 = vpop.f32.mrb[7].mxu0 }
 0x33f   :  { %v744_v51 = vadd.f32 %v841_v31, %v612_v40  ;;  %v844_v34 = vadd.f32 %v843_v33, %v842_v32 }
 0x341   :  { %750 = vst [vmem:[#allocation8] sm:$0xff] %v744_v51  ;;  %v747_v35 = vadd.f32 %v844_v34, %v612_v40 }
 0x343   :  { %751 = vst [vmem:[#allocation8 + $0x8] sm:$0xff] %v747_v35 }
 0x344   :  { %984 = shalt.err (!%p981_p6)
}
 0x345   :  { %s985_s28 = scalar_lea.hbm %s1173_s9, 256 }
 0x346   :  { %p986_p7 = scmp.ne.s32.totalorder %s1173_s9, %s985_s28  ;;  %p989_p8 = scmp.lt.u32.totalorder %s985_s28, %s1173_s9 }
 0x348   :  { %p991_p9 = pnand %p989_p8, %p986_p7 }
 0x34a   :  { %994 = shalt.err (!%p991_p9)
}
 0x34b   :  { %763 = dma.vmem_to_hbm [thread:$0]  %s758_s25, 256, %s1173_s9, [#allocation5], %s1002_s19, %s1002_s19, %s1003_s20  }
 0x34c   :  { %999 = dma.done.wait [#allocation5], 256  }
 0x34d   :  { %1000 = vsyncadd [#allocation5], 4294967040 }
 0x34e   :  { %767 = vsyncpa [#allocation4], 1 }
 0x34f   :  { %768 = vsyncpa [#allocation7], 1 }
 0x350   :  { %769 = vsyncpa [#allocation5], 1 }

</bundles_post_ra>
